<compile_context>
chip_gen: v7x
topology: tpu7x:2x2x1
jax: 0.10.0
libtpu: 0.0.40
codegen_flags: <defaults>
</compile_context>

<pallas_src>
import math

import jax
import jax.numpy as jnp
from jax.experimental import pallas as pl
from jax.experimental.pallas import tpu as pltpu


# ------------------------------ small helpers ------------------------------

def _round_up(x, m):
    return ((x + m - 1) // m) * m


def _pad_rows(a, m_pad):
    m = a.shape[0]
    if m == m_pad:
        return a
    return jnp.pad(a, ((0, m_pad - m),) + ((0, 0),) * (a.ndim - 1))


def _pad_cols(a, n_pad):
    n = a.shape[-1]
    if n == n_pad:
        return a
    return jnp.pad(a, ((0, 0),) * (a.ndim - 1) + ((0, n_pad - n),))


def _edge_tiling(e, max_tile=512):
    """Edge-row tile.  Single tile (== padded E) for small E; otherwise a
    128-aligned tile (the row-id block is lane-major, so its last dim must be
    either the full array extent or a multiple of 128)."""
    if e <= max_tile:
        tm = _round_up(max(e, 1), 16)          # bf16 packs 2 rows / sublane
        return tm, tm
    return max_tile, _round_up(e, max_tile)    # max_tile is a multiple of 128


def _node_tiling(n, max_tile=512):
    """Node-row tile.  For larger N keep >= 2 tiles so the 'parallel' grid
    axis can shard across both v7x TensorCores."""
    if n <= 64:
        tm = _round_up(max(n, 1), 16)
        return tm, tm
    tm = min(max_tile, _round_up(-(-n // 2), 16))
    return tm, _round_up(n, tm)


# ------------------------------ Pallas kernels ------------------------------

def _edge_agg_kernel(edge_ref, row_ref, w1_ref, b1_ref, w2_ref, b2_ref,
                     agg_ref):
    """Fused edge MLP + segment-sum for one edge-row tile.

    edge_ref: [tm, 2*in+1] bf16   row_ref: [1, tm] int32 (sentinel = N_pad)
    agg_ref : [N_pad, out_pad] f32 accumulator, resident across the grid.
    """
    @pl.when(pl.program_id(0) == 0)
    def _():
        agg_ref[...] = jnp.zeros_like(agg_ref)

    # Layer 1 (single stacked matmul, K = 2*in+1) + SiLU.
    h = jnp.dot(edge_ref[...], w1_ref[...],
                preferred_element_type=jnp.float32) + b1_ref[...]
    h = h * jax.nn.sigmoid(h)
    # Layer 2.
    y = jnp.dot(h.astype(jnp.bfloat16), w2_ref[...],
                preferred_element_type=jnp.float32) + b2_ref[...]

    # Segment-sum: agg[n, :] += sum_k [row_ids[k] == n] * y[k, :] on the MXU.
    n_pad = agg_ref.shape[0]
    tm = row_ref.shape[1]
    onehot_t = (jax.lax.broadcasted_iota(jnp.int32, (n_pad, tm), 0)
                == row_ref[...]).astype(jnp.bfloat16)
    agg_ref[...] += jnp.dot(onehot_t, y.astype(jnp.bfloat16),
                            preferred_element_type=jnp.float32)


def _node_mlp_kernel(xin_ref, w1_ref, b1_ref, w2_ref, b2_ref, o_ref):
    """Fused node MLP (single stacked K = in+out matmul) for one node tile."""
    h = jnp.dot(xin_ref[...], w1_ref[...],
                preferred_element_type=jnp.float32) + b1_ref[...]
    h = h * jax.nn.sigmoid(h)
    o_ref[...] = jnp.dot(h.astype(jnp.bfloat16), w2_ref[...],
                         preferred_element_type=jnp.float32) + b2_ref[...]


# ------------------------------ kernel wrappers ------------------------------

def _edge_mlp_and_aggregate(edge_in, row, n_nodes, p):
    """edge_in: [E, 2*in+1] (f32), row: [E] int32.  Returns agg [N_pad, out_pad] f32."""
    e, k_e = edge_in.shape
    hid, out = p["w2"].shape
    hp = _round_up(hid, 128)                    # lane-dense hidden
    op = _round_up(out, 128)                    # lane-dense output
    n_pad = _round_up(max(n_nodes, 1), 8)
    tm, e_pad = _edge_tiling(e)

    w1 = _pad_cols(p["w1"], hp).astype(jnp.bfloat16)               # [k_e, hp]
    b1 = _pad_cols(p["b1"].reshape(1, -1), hp).astype(jnp.float32)
    w2 = _pad_cols(_pad_rows(p["w2"], hp), op).astype(jnp.bfloat16)
    b2 = _pad_cols(p["b2"].reshape(1, -1), op).astype(jnp.float32)

    edge_b = _pad_rows(edge_in.astype(jnp.bfloat16), e_pad)
    # Sentinel row-id (== n_pad) for padded edges -> zero one-hot column.
    row_ids = jnp.full((e_pad,), n_pad, dtype=jnp.int32)
    row_ids = row_ids.at[:e].set(row.astype(jnp.int32)).reshape(1, e_pad)

    agg = pl.pallas_call(
        _edge_agg_kernel,
        grid=(e_pad // tm,),
        in_specs=[
            pl.BlockSpec((tm, k_e), lambda i: (i, 0)),
            pl.BlockSpec((1, tm), lambda i: (0, i)),
            pl.BlockSpec((k_e, hp), lambda i: (0, 0)),
            pl.BlockSpec((1, hp), lambda i: (0, 0)),
            pl.BlockSpec((hp, op), lambda i: (0, 0)),
            pl.BlockSpec((1, op), lambda i: (0, 0)),
        ],
        out_specs=pl.BlockSpec((n_pad, op), lambda i: (0, 0)),
        out_shape=jax.ShapeDtypeStruct((n_pad, op), jnp.float32),
        compiler_params=pltpu.CompilerParams(
            dimension_semantics=("arbitrary",),    # reduction into shared agg
            vmem_limit_bytes=32 * 1024 * 1024,
        ),
    )(edge_b, row_ids, w1, b1, w2, b2)
    return agg                                     # [n_pad, op] f32


def _node_mlp(node_in, p):
    """node_in: [N, in+out] (f32).  Returns [N, out] f32."""
    n, k_n = node_in.shape
    hid, out = p["w2"].shape
    hp = _round_up(hid, 128)
    op = _round_up(out, 128)
    tm, n_pad = _node_tiling(n)

    w1 = _pad_cols(p["w1"], hp).astype(jnp.bfloat16)               # [k_n, hp]
    b1 = _pad_cols(p["b1"].reshape(1, -1), hp).astype(jnp.float32)
    w2 = _pad_cols(_pad_rows(p["w2"], hp), op).astype(jnp.bfloat16)
    b2 = _pad_cols(p["b2"].reshape(1, -1), op).astype(jnp.float32)

    xin = _pad_rows(node_in.astype(jnp.bfloat16), n_pad)

    out_pad = pl.pallas_call(
        _node_mlp_kernel,
        grid=(n_pad // tm,),
        in_specs=[
            pl.BlockSpec((tm, k_n), lambda i: (i, 0)),
            pl.BlockSpec((k_n, hp), lambda i: (0, 0)),
            pl.BlockSpec((1, hp), lambda i: (0, 0)),
            pl.BlockSpec((hp, op), lambda i: (0, 0)),
            pl.BlockSpec((1, op), lambda i: (0, 0)),
        ],
        out_specs=pl.BlockSpec((tm, op), lambda i: (i, 0)),
        out_shape=jax.ShapeDtypeStruct((n_pad, op), jnp.float32),
        compiler_params=pltpu.CompilerParams(
            dimension_semantics=("parallel",),      # independent node tiles
            vmem_limit_bytes=32 * 1024 * 1024,
        ),
    )(xin, w1, b1, w2, b2)
    return out_pad[:n, :out]


# ------------------------------ EGNN layer ------------------------------

def init_egnn_params(key, in_dim, out_dim):
    """PyTorch-style uniform(+-1/sqrt(fan_in)) init, deterministic from `key`."""
    ks = jax.random.split(key, 8)

    def lin(kw, kb, fin, fout):
        bound = 1.0 / math.sqrt(fin)
        w = jax.random.uniform(kw, (fin, fout), jnp.float32, -bound, bound)
        b = jax.random.uniform(kb, (fout,), jnp.float32, -bound, bound)
        return w, b

    e1w, e1b = lin(ks[0], ks[1], 2 * in_dim + 1, out_dim)
    e2w, e2b = lin(ks[2], ks[3], out_dim, out_dim)
    n1w, n1b = lin(ks[4], ks[5], in_dim + out_dim, out_dim)
    n2w, n2b = lin(ks[6], ks[7], out_dim, out_dim)
    return {
        "edge": {"w1": e1w, "b1": e1b, "w2": e2w, "b2": e2b},
        "node": {"w1": n1w, "b1": n1b, "w2": n2w, "b2": n2b},
    }


def egnn_layer_forward(x, edge_index, coords, params):
    """x: [N, in_dim], edge_index: [2, E] (row, col), coords: [N, 3]."""
    n, in_dim = x.shape
    out_dim = params["edge"]["w2"].shape[1]

    # TODO(synk): the data-dependent gather x[row]/x[col]/coords stays in plain
    # JAX (a Pallas version would need per-edge DMA gather via scalar prefetch).
    row = edge_index[0]
    col = edge_index[1]
    diff = coords[row] - coords[col]
    radial = jnp.sum(diff * diff, axis=-1, keepdims=True)
    edge_in = jnp.concatenate([x[row], x[col], radial], axis=-1)   # [E, 2*in+1]

    # Fused edge MLP + scatter-add (agg = zeros_like(x).index_add_(0, row, .)).
    agg = _edge_mlp_and_aggregate(edge_in, row, n, params["edge"])  # [n_pad, op]

    node_in = jnp.concatenate([x, agg[:n, :out_dim]], axis=-1)      # [N, in+out]
    return _node_mlp(node_in, params["node"])                       # [N, out_dim]


def egnn_layer_reference(x, edge_index, coords, params):
    """Pure-JAX f32 reference matching the PyTorch forward literally."""
    row = edge_index[0]
    col = edge_index[1]
    x_i, x_j = x[row], x[col]
    diff = coords[row] - coords[col]
    radial = jnp.sum(diff * diff, axis=-1, keepdims=True)
    edge_in = jnp.concatenate([x_i, x_j, radial], axis=-1)
    pe = params["edge"]
    h = edge_in @ pe["w1"] + pe["b1"]
    h = h * jax.nn.sigmoid(h)
    edge_feat = h @ pe["w2"] + pe["b2"]
    agg = jnp.zeros_like(x).at[row].add(edge_feat)
    node_in = jnp.concatenate([x, agg], axis=-1)
    pn = params["node"]
    h = node_in @ pn["w1"] + pn["b1"]
    h = h * jax.nn.sigmoid(h)
    return h @ pn["w2"] + pn["b2"]


# ----------------------------------- main -----------------------------------

if __name__ == "__main__":
    # Small shapes consistent with the module; out_dim == in_dim because the
    # reference does index_add_ of edge_feat into zeros_like(x).
    N, in_dim, out_dim = 16, 32, 32

    key = jax.random.PRNGKey(0)
    kx, kc, kp = jax.random.split(key, 3)
    x = jax.random.normal(kx, (N, in_dim), jnp.float32)
    coords = jax.random.normal(kc, (N, 3), jnp.float32)

    # Chain graph: bidirectional (i, i+1) edges -> E = 2 * (N - 1) = 30.
    row = jnp.concatenate([jnp.arange(N - 1), jnp.arange(1, N)])
    col = jnp.concatenate([jnp.arange(1, N), jnp.arange(N - 1)])
    edge_index = jnp.stack([row, col]).astype(jnp.int32)

    params = init_egnn_params(kp, in_dim, out_dim)

    fwd = jax.jit(egnn_layer_forward)
    out = fwd(x, edge_index, coords, params)
    jax.block_until_ready(out)

    ref = egnn_layer_reference(x, edge_index, coords, params)

    assert out.shape == (N, out_dim)
    assert bool(jnp.all(jnp.isfinite(out)))
    max_diff = float(jnp.max(jnp.abs(out - ref)))
    assert bool(jnp.allclose(out, ref, atol=2e-1, rtol=2e-1)), (
        "max abs diff = %f" % max_diff)
    print("KERNEL_OK")
</pallas_src>

<mosaic_0001>
module attributes {stable_mosaic.version = 11 : i64} {
  func.func @_node_mlp_kernel(%arg0: i32, %arg1: memref<16x64xbf16, #tpu.memory_space<vmem>>, %arg2: memref<64x128xbf16, #tpu.memory_space<vmem>>, %arg3: memref<1x128xf32, #tpu.memory_space<vmem>>, %arg4: memref<128x128xbf16, #tpu.memory_space<vmem>>, %arg5: memref<1x128xf32, #tpu.memory_space<vmem>>, %arg6: memref<16x128xf32, #tpu.memory_space<vmem>>) attributes {dimension_semantics = [#tpu.dimension_semantics<parallel>], iteration_bounds = array<i64: 1>, scalar_prefetch = 0 : i64, scratch_operands = 0 : i64, tpu.core_type = #tpu.core_type<tc>, window_params = [{transform_indices = @transform_0, window_bounds = array<i64: 16, 64>}, {pipeline_mode = #tpu.pipeline_mode<synchronous>, transform_indices = @transform_1, window_bounds = array<i64: 64, 128>}, {pipeline_mode = #tpu.pipeline_mode<synchronous>, transform_indices = @transform_2, window_bounds = array<i64: 1, 128>}, {pipeline_mode = #tpu.pipeline_mode<synchronous>, transform_indices = @transform_3, window_bounds = array<i64: 128, 128>}, {pipeline_mode = #tpu.pipeline_mode<synchronous>, transform_indices = @transform_4, window_bounds = array<i64: 1, 128>}, {transform_indices = @transform_5, window_bounds = array<i64: 16, 128>}]} {
    %c0 = arith.constant 0 : index
    %c0_0 = arith.constant 0 : index
    %0 = vector.load %arg1[%c0, %c0_0] : memref<16x64xbf16, #tpu.memory_space<vmem>>, vector<16x64xbf16>
    %c0_1 = arith.constant 0 : index
    %c0_2 = arith.constant 0 : index
    %1 = vector.load %arg2[%c0_1, %c0_2] : memref<64x128xbf16, #tpu.memory_space<vmem>>, vector<64x128xbf16>
    %cst = arith.constant dense<0.000000e+00> : vector<16x128xf32>
    %2 = tpu.matmul %0, %1, %cst {dimension_numbers = #tpu.dot_dimension_numbers<[1], [0], [0], [1], [0, 0, 1, 1], [], []>} : vector<16x64xbf16>, vector<64x128xbf16>, vector<16x128xf32> -> vector<16x128xf32>
    %c0_3 = arith.constant 0 : index
    %c0_4 = arith.constant 0 : index
    %3 = vector.load %arg3[%c0_3, %c0_4] : memref<1x128xf32, #tpu.memory_space<vmem>>, vector<1x128xf32>
    %4 = vector.broadcast %3 : vector<1x128xf32> to vector<16x128xf32>
    %5 = arith.addf %2, %4 : vector<16x128xf32>
    %6 = arith.negf %5 : vector<16x128xf32>
    %7 = math.exp %6 : vector<16x128xf32>
    %cst_5 = arith.constant 1.000000e+00 : f32
    %8 = vector.broadcast %cst_5 : f32 to vector<16x128xf32>
    %9 = arith.addf %8, %7 : vector<16x128xf32>
    %10 = arith.divf %8, %9 : vector<16x128xf32>
    %11 = arith.mulf %5, %10 : vector<16x128xf32>
    %12 = arith.truncf %11 : vector<16x128xf32> to vector<16x128xbf16>
    %c0_6 = arith.constant 0 : index
    %c0_7 = arith.constant 0 : index
    %13 = vector.load %arg4[%c0_6, %c0_7] : memref<128x128xbf16, #tpu.memory_space<vmem>>, vector<128x128xbf16>
    %cst_8 = arith.constant dense<0.000000e+00> : vector<16x128xf32>
    %14 = tpu.matmul %12, %13, %cst_8 {dimension_numbers = #tpu.dot_dimension_numbers<[1], [0], [0], [1], [0, 0, 1, 1], [], []>} : vector<16x128xbf16>, vector<128x128xbf16>, vector<16x128xf32> -> vector<16x128xf32>
    %c0_9 = arith.constant 0 : index
    %c0_10 = arith.constant 0 : index
    %15 = vector.load %arg5[%c0_9, %c0_10] : memref<1x128xf32, #tpu.memory_space<vmem>>, vector<1x128xf32>
    %16 = vector.broadcast %15 : vector<1x128xf32> to vector<16x128xf32>
    %17 = arith.addf %14, %16 : vector<16x128xf32>
    %c0_11 = arith.constant 0 : index
    %c0_12 = arith.constant 0 : index
    %18 = vector.load %arg6[%c0_11, %c0_12] : memref<16x128xf32, #tpu.memory_space<vmem>>, vector<16x128xf32>
    tpu.vector_store %arg6[%c0_11, %c0_12], %17 {strides = array<i32>} : memref<16x128xf32, #tpu.memory_space<vmem>>, vector<16x128xf32>,
    return
  }
  func.func @transform_0(%arg0: i32) -> (i32, i32) {
    %c0_i32 = arith.constant 0 : i32
    %c0_i32_0 = arith.constant 0 : i32
    return %arg0, %c0_i32 : i32, i32
  }
  func.func @transform_1(%arg0: i32) -> (i32, i32) {
    %c0_i32 = arith.constant 0 : i32
    %c0_i32_0 = arith.constant 0 : i32
    %c0_i32_1 = arith.constant 0 : i32
    return %c0_i32, %c0_i32_0 : i32, i32
  }
  func.func @transform_2(%arg0: i32) -> (i32, i32) {
    %c0_i32 = arith.constant 0 : i32
    %c0_i32_0 = arith.constant 0 : i32
    %c0_i32_1 = arith.constant 0 : i32
    return %c0_i32, %c0_i32_0 : i32, i32
  }
  func.func @transform_3(%arg0: i32) -> (i32, i32) {
    %c0_i32 = arith.constant 0 : i32
    %c0_i32_0 = arith.constant 0 : i32
    %c0_i32_1 = arith.constant 0 : i32
    return %c0_i32, %c0_i32_0 : i32, i32
  }
  func.func @transform_4(%arg0: i32) -> (i32, i32) {
    %c0_i32 = arith.constant 0 : i32
    %c0_i32_0 = arith.constant 0 : i32
    %c0_i32_1 = arith.constant 0 : i32
    return %c0_i32, %c0_i32_0 : i32, i32
  }
  func.func @transform_5(%arg0: i32) -> (i32, i32) {
    %c0_i32 = arith.constant 0 : i32
    %c0_i32_0 = arith.constant 0 : i32
    return %arg0, %c0_i32 : i32, i32
  }
}

module attributes {stable_mosaic.version = 11 : i64} {
  func.func @_edge_agg_kernel(%arg0: i32, %arg1: memref<32x65xbf16, #tpu.memory_space<vmem>>, %arg2: memref<1x32xi32, #tpu.memory_space<vmem>>, %arg3: memref<65x128xbf16, #tpu.memory_space<vmem>>, %arg4: memref<1x128xf32, #tpu.memory_space<vmem>>, %arg5: memref<128x128xbf16, #tpu.memory_space<vmem>>, %arg6: memref<1x128xf32, #tpu.memory_space<vmem>>, %arg7: memref<16x128xf32, #tpu.memory_space<vmem>>) attributes {dimension_semantics = [#tpu.dimension_semantics<arbitrary>], iteration_bounds = array<i64: 1>, scalar_prefetch = 0 : i64, scratch_operands = 0 : i64, tpu.core_type = #tpu.core_type<tc>, window_params = [{transform_indices = @transform_0, window_bounds = array<i64: 32, 65>}, {transform_indices = @transform_1, window_bounds = array<i64: 1, 32>}, {pipeline_mode = #tpu.pipeline_mode<synchronous>, transform_indices = @transform_2, window_bounds = array<i64: 65, 128>}, {pipeline_mode = #tpu.pipeline_mode<synchronous>, transform_indices = @transform_3, window_bounds = array<i64: 1, 128>}, {pipeline_mode = #tpu.pipeline_mode<synchronous>, transform_indices = @transform_4, window_bounds = array<i64: 128, 128>}, {pipeline_mode = #tpu.pipeline_mode<synchronous>, transform_indices = @transform_5, window_bounds = array<i64: 1, 128>}, {pipeline_mode = #tpu.pipeline_mode<synchronous>, transform_indices = @transform_6, window_bounds = array<i64: 16, 128>}]} {
    %c0_i32 = arith.constant 0 : i32
    %0 = arith.cmpi eq, %arg0, %c0_i32 : i32
    %1 = arith.extui %0 : i1 to i32
    %c0_i32_0 = arith.constant 0 : i32
    %2 = arith.cmpi ne, %1, %c0_i32_0 : i32
    scf.if %2 {
      %cst_19 = arith.constant 0.000000e+00 : f32
      %33 = vector.broadcast %cst_19 : f32 to vector<16x128xf32>
      %c0_20 = arith.constant 0 : index
      %c0_21 = arith.constant 0 : index
      %34 = vector.load %arg7[%c0_20, %c0_21] : memref<16x128xf32, #tpu.memory_space<vmem>>, vector<16x128xf32>
      tpu.vector_store %arg7[%c0_20, %c0_21], %33 {strides = array<i32>} : memref<16x128xf32, #tpu.memory_space<vmem>>, vector<16x128xf32>,
    } else {
    }
    %c0 = arith.constant 0 : index
    %c0_1 = arith.constant 0 : index
    %3 = vector.load %arg1[%c0, %c0_1] : memref<32x65xbf16, #tpu.memory_space<vmem>>, vector<32x65xbf16>
    %c0_2 = arith.constant 0 : index
    %c0_3 = arith.constant 0 : index
    %4 = vector.load %arg3[%c0_2, %c0_3] : memref<65x128xbf16, #tpu.memory_space<vmem>>, vector<65x128xbf16>
    %cst = arith.constant dense<0.000000e+00> : vector<32x128xf32>
    %5 = tpu.matmul %3, %4, %cst {dimension_numbers = #tpu.dot_dimension_numbers<[1], [0], [0], [1], [0, 0, 1, 1], [], []>} : vector<32x65xbf16>, vector<65x128xbf16>, vector<32x128xf32> -> vector<32x128xf32>
    %c0_4 = arith.constant 0 : index
    %c0_5 = arith.constant 0 : index
    %6 = vector.load %arg4[%c0_4, %c0_5] : memref<1x128xf32, #tpu.memory_space<vmem>>, vector<1x128xf32>
    %7 = vector.broadcast %6 : vector<1x128xf32> to vector<32x128xf32>
    %8 = arith.addf %5, %7 : vector<32x128xf32>
    %9 = arith.negf %8 : vector<32x128xf32>
    %10 = math.exp %9 : vector<32x128xf32>
    %cst_6 = arith.constant 1.000000e+00 : f32
    %11 = vector.broadcast %cst_6 : f32 to vector<32x128xf32>
    %12 = arith.addf %11, %10 : vector<32x128xf32>
    %13 = arith.divf %11, %12 : vector<32x128xf32>
    %14 = arith.mulf %8, %13 : vector<32x128xf32>
    %15 = arith.truncf %14 : vector<32x128xf32> to vector<32x128xbf16>
    %c0_7 = arith.constant 0 : index
    %c0_8 = arith.constant 0 : index
    %16 = vector.load %arg5[%c0_7, %c0_8] : memref<128x128xbf16, #tpu.memory_space<vmem>>, vector<128x128xbf16>
    %cst_9 = arith.constant dense<0.000000e+00> : vector<32x128xf32>
    %17 = tpu.matmul %15, %16, %cst_9 {dimension_numbers = #tpu.dot_dimension_numbers<[1], [0], [0], [1], [0, 0, 1, 1], [], []>} : vector<32x128xbf16>, vector<128x128xbf16>, vector<32x128xf32> -> vector<32x128xf32>
    %c0_10 = arith.constant 0 : index
    %c0_11 = arith.constant 0 : index
    %18 = vector.load %arg6[%c0_10, %c0_11] : memref<1x128xf32, #tpu.memory_space<vmem>>, vector<1x128xf32>
    %19 = vector.broadcast %18 : vector<1x128xf32> to vector<32x128xf32>
    %20 = arith.addf %17, %19 : vector<32x128xf32>
    %21 = tpu.iota {dimensions = array<i32: 0>} : vector<16x32xi32>
    %c0_12 = arith.constant 0 : index
    %c0_13 = arith.constant 0 : index
    %22 = vector.load %arg2[%c0_12, %c0_13] : memref<1x32xi32, #tpu.memory_space<vmem>>, vector<1x32xi32>
    %23 = vector.broadcast %22 : vector<1x32xi32> to vector<16x32xi32>
    %24 = arith.cmpi eq, %21, %23 : vector<16x32xi32>
    %25 = arith.extui %24 : vector<16x32xi1> to vector<16x32xi32>
    %26 = arith.sitofp %25 : vector<16x32xi32> to vector<16x32xf32>
    %27 = arith.truncf %26 : vector<16x32xf32> to vector<16x32xbf16>
    %c0_14 = arith.constant 0 : index
    %c0_15 = arith.constant 0 : index
    %28 = vector.load %arg7[%c0_14, %c0_15] : memref<16x128xf32, #tpu.memory_space<vmem>>, vector<16x128xf32>
    %29 = arith.truncf %20 : vector<32x128xf32> to vector<32x128xbf16>
    %cst_16 = arith.constant dense<0.000000e+00> : vector<16x128xf32>
    %30 = tpu.matmul %27, %29, %cst_16 {dimension_numbers = #tpu.dot_dimension_numbers<[1], [0], [0], [1], [0, 0, 1, 1], [], []>} : vector<16x32xbf16>, vector<32x128xbf16>, vector<16x128xf32> -> vector<16x128xf32>
    %31 = arith.addf %28, %30 : vector<16x128xf32>
    %c0_17 = arith.constant 0 : index
    %c0_18 = arith.constant 0 : index
    %32 = vector.load %arg7[%c0_17, %c0_18] : memref<16x128xf32, #tpu.memory_space<vmem>>, vector<16x128xf32>
    tpu.vector_store %arg7[%c0_17, %c0_18], %31 {strides = array<i32>} : memref<16x128xf32, #tpu.memory_space<vmem>>, vector<16x128xf32>,
    return
  }
  func.func @transform_0(%arg0: i32) -> (i32, i32) {
    %c0_i32 = arith.constant 0 : i32
    %c0_i32_0 = arith.constant 0 : i32
    return %arg0, %c0_i32 : i32, i32
  }
  func.func @transform_1(%arg0: i32) -> (i32, i32) {
    %c0_i32 = arith.constant 0 : i32
    %c0_i32_0 = arith.constant 0 : i32
    return %c0_i32, %arg0 : i32, i32
  }
  func.func @transform_2(%arg0: i32) -> (i32, i32) {
    %c0_i32 = arith.constant 0 : i32
    %c0_i32_0 = arith.constant 0 : i32
    %c0_i32_1 = arith.constant 0 : i32
    return %c0_i32, %c0_i32_0 : i32, i32
  }
  func.func @transform_3(%arg0: i32) -> (i32, i32) {
    %c0_i32 = arith.constant 0 : i32
    %c0_i32_0 = arith.constant 0 : i32
    %c0_i32_1 = arith.constant 0 : i32
    return %c0_i32, %c0_i32_0 : i32, i32
  }
  func.func @transform_4(%arg0: i32) -> (i32, i32) {
    %c0_i32 = arith.constant 0 : i32
    %c0_i32_0 = arith.constant 0 : i32
    %c0_i32_1 = arith.constant 0 : i32
    return %c0_i32, %c0_i32_0 : i32, i32
  }
  func.func @transform_5(%arg0: i32) -> (i32, i32) {
    %c0_i32 = arith.constant 0 : i32
    %c0_i32_0 = arith.constant 0 : i32
    %c0_i32_1 = arith.constant 0 : i32
    return %c0_i32, %c0_i32_0 : i32, i32
  }
  func.func @transform_6(%arg0: i32) -> (i32, i32) {
    %c0_i32 = arith.constant 0 : i32
    %c0_i32_0 = arith.constant 0 : i32
    %c0_i32_1 = arith.constant 0 : i32
    return %c0_i32, %c0_i32_0 : i32, i32
  }
}

</mosaic_0001>

<bundles_post_ra>
// kernel: egnn_layer_forward.3
= control target key start
LH: loop header
LB: loop body
LE: loop exit
PB: predicated region body
PF: predicated region fallthrough
CT: control target
= control target key end

     0   :  { %v372_v1 = vmov 0.0   ;;  %vm373_vm0 = vmmov 0   ;;  %s464_s0 = inlined_call_operand.vmem [shape: bf16[16,64], index: 0, kind: input, shape index: {}]   ;;  %s465_s1 = inlined_call_operand.vmem [shape: bf16[64,128], index: 1, kind: input, shape index: {}]   ;;  %s466_s2 = inlined_call_operand.vmem [shape: f32[1,128], index: 2, kind: input, shape index: {}]   ;;  %s467_s3 = inlined_call_operand.vmem [shape: bf16[128,128], index: 3, kind: input, shape index: {}]   ;;  %s468_s4 = inlined_call_operand.vmem [shape: f32[1,128], index: 4, kind: input, shape index: {}]   ;;  %s469_s5 = inlined_call_operand.hbm [shape: f32[16,128], index: 5, kind: output, shape index: {}]  }
   0x1   :  { %v327_v0 = vld [vmem:[%s465_s1] sm:$0xff]   ;;  %290 = vmatprep.subr.bf16.mxu0 %v372_v1  ;;  %302 = vmatprep.subr.bf16.mxu1 %v372_v1  ;;  %v328_v2 = vld [vmem:[%s465_s1 + $0x8] sm:$0xff]   ;;  %v329_v3 = vld [vmem:[%s465_s1 + $0x10] sm:$0xff]  }
   0x2   :  { %291 = vmatpush3.bf16.msra.mxu0 %v327_v0  ;;  %298 = vmatprep.mubr.msk.bf16.mxu0 %vm373_vm0, %v372_v1  ;;  %v330_v4 = vld [vmem:[%s465_s1 + $0x18] sm:$0xff]  }
   0x3   :  { %292 = vmatprep.subr.bf16.mxu0 %v372_v1  ;;  %318 = vmatprep.mubr.msk.bf16.mxu1 %vm373_vm0, %v372_v1 }
   0x6   :  { %293 = vmatpush3.bf16.msra.mxu0 %v328_v2 }
   0x7   :  { %294 = vmatprep.subr.bf16.mxu0 %v372_v1 }
   0xa   :  { %295 = vmatpush3.bf16.msra.mxu0 %v329_v3 }
   0xb   :  { %10 = vsyncpa [#allocation3], 0  ;;  %296 = vmatprep.subr.bf16.mxu0 %v372_v1  ;;  %v331_v5 = vld [vmem:[%s464_s0] sm:$0xff]   ;;  %vm68_vm1 = vcmask 523264   ;;  %v333_v7 = vld [vmem:[%s467_s3 + $0x8] sm:$0xff]   ;;  %s374_s19 = smov [#allocation2]  }
   0xc   :  { %v332_v6 = vld [vmem:[%s467_s3] sm:$0xff]   ;;  %v334_v8 = vld [vmem:[%s467_s3 + $0x10] sm:$0xff]   ;;  %v335_v9 = vld [vmem:[%s467_s3 + $0x18] sm:$0xff]   ;;  %s247_s20 = sshll.u32 %s374_s19, 4  ;;  %s248_s20 = int_to_ptr.vmem [resolvable:$true] %s247_s20 }
   0xd   :  { %303 = vmatpush3.bf16.msra.mxu1 %v332_v6  ;;  %v336_v10 = vld [vmem:[%s467_s3 + $0x20] sm:$0xff]   ;;  %v337_v11 = vld [vmem:[%s467_s3 + $0x28] sm:$0xff]   ;;  %v338_v12 = vld [vmem:[%s467_s3 + $0x30] sm:$0xff]   ;;  %s348_s21 = scalar_lea.vmem %s248_s20, 256  ;;  %p353_p1 = scmp.lt.s32.totalorder %s248_s20, %s248_s20 }
   0xe   :  { %297 = vmatpush3.bf16.msra.mxu0 %v330_v4  ;;  %304 = vmatprep.subr.bf16.mxu1 %v372_v1  ;;  %v339_v13 = vld [vmem:[%s467_s3 + $0x38] sm:$0xff]   ;;  %v258_v14 = vld [vmem:[%s466_s2] ss:$0 sm:$0xff]  ;;  %p349_p0 = scmp.ne.s32.totalorder %s248_s20, %s348_s21  ;;  %p354_p2 = scmp.lt.s32.totalorder %s348_s21, %s348_s21 }
   0xf   :  { %v267_v32 = vld [vmem:[%s468_s4] ss:$0 sm:$0xff] }
  0x10   :  { %p355_p3 = por %p354_p2, %p353_p1 }
  0x11   :  { %299 = vmatmul.mubr.msk.bf16.vlgmr.msra.gmra.mrb[0].mxu0 %vm68_vm1, %v331_v5  ;;  %305 = vmatpush3.bf16.msra.mxu1 %v333_v7 }
  0x12   :  { %306 = vmatprep.subr.bf16.mxu1 %v372_v1  ;;  %p356_p4 = pnand %p355_p3, %p349_p0 }
  0x15   :  { %307 = vmatpush3.bf16.msra.mxu1 %v334_v8 }
  0x16   :  { %308 = vmatprep.subr.bf16.mxu1 %v372_v1 }
  0x19   :  { %309 = vmatpush3.bf16.msra.mxu1 %v335_v9 }
  0x1a   :  { %310 = vmatprep.subr.bf16.mxu1 %v372_v1 }
  0x1d   :  { %311 = vmatpush3.bf16.msra.mxu1 %v336_v10 }
  0x1e   :  { %312 = vmatprep.subr.bf16.mxu1 %v372_v1 }
  0x21   :  { %313 = vmatpush3.bf16.msra.mxu1 %v337_v11 }
  0x22   :  { %314 = vmatprep.subr.bf16.mxu1 %v372_v1 }
  0x25   :  { %315 = vmatpush3.bf16.msra.mxu1 %v338_v12 }
  0x26   :  { %316 = vmatprep.subr.bf16.mxu1 %v372_v1 }
  0x29   :  { %317 = vmatpush3.bf16.msra.mxu1 %v339_v13 }
  0xe4   :  { %v106_v15 = vpop.f32.mrb[0].mxu0 }
  0xe5   :  { %v107_v16 = vadd.f32 %v258_v14, %v106_v15  ;;  %v300_v17 = vpop.f32.mrb[1].mxu0 }
  0xe6   :  { %v109_v18 = vpop.f32.mrb[2].mxu0 }
  0xe7   :  { %v265_v19 = vmul.f32 -1.442695, %v107_v16  ;;  %v110_v20 = vadd.f32 %v258_v14, %v109_v18  ;;  %v301_v21 = vpop.f32.mrb[3].mxu0 }
  0xe9   :  { %340 = vpow2.f32 %v265_v19  ;;  %v266_v22 = vmul.f32 -1.442695, %v110_v20 }
  0xeb   :  { %342 = vpow2.f32 %v266_v22 }
  0xf3   :  { %v341_v23 = vpop.eup %340 }
  0xf4   :  { %v119_v24 = vadd.f32 1.0, %v341_v23 }
  0xf5   :  { %v343_v25 = vpop.eup %342 }
  0xf6   :  { %344 = vrcp.f32 %v119_v24  ;;  %v120_v26 = vadd.f32 1.0, %v343_v25 }
  0xf8   :  { %346 = vrcp.f32 %v120_v26 }
 0x100   :  { %v345_v27 = vpop.eup %344 }
 0x101   :  { %v125_v29 = vmul.f32 %v345_v27, %v107_v16 }
 0x102   :  { %v347_v28 = vpop.eup %346 }
 0x103   :  { %v126_v30 = vmul.f32 %v347_v28, %v110_v20 }
 0x105   :  { %v127_v31 = vpack.c.bf16 %v126_v30, %v125_v29 }
 0x107   :  { %319 = vmatmul.mubr.bf16.vlgmr.msra.gmra.mrb[0].mxu1 %v127_v31 }
 0x1da   :  { %v233_v33 = vpop.f32.mrb[0].mxu1 }
 0x1db   :  { %v234_v34 = vadd.f32 %v267_v32, %v233_v33  ;;  %v320_v35 = vpop.f32.mrb[1].mxu1 }
 0x1dc   :  { %v236_v36 = vpop.f32.mrb[2].mxu1 }
 0x1dd   :  { %240 = vst [vmem:[#allocation2] sm:$0xff] %v234_v34  ;;  %v237_v37 = vadd.f32 %v267_v32, %v236_v36  ;;  %v321_v38 = vpop.f32.mrb[3].mxu1 }
 0x1df   :  { %241 = vst [vmem:[#allocation2 + $0x8] sm:$0xff] %v237_v37 }
 0x1e0   :  { %359 = shalt.err (!%p356_p4)
}
 0x1e1   :  { %s360_s23 = scalar_lea.hbm %s469_s5, 256 }
 0x1e2   :  { %p361_p5 = scmp.ne.s32.totalorder %s469_s5, %s360_s23  ;;  %p364_p6 = scmp.lt.u32.totalorder %s360_s23, %s469_s5 }
 0x1e4   :  { %p366_p7 = pnand %p364_p6, %p361_p5 }
 0x1e6   :  { %369 = shalt.err (!%p366_p7)
}
 0x1e7   :  { %s375_s28 = smov 128   ;;  %s376_s29 = smov 8  }
 0x1e8   :  { %253 = dma.vmem_to_hbm [thread:$0]  %s248_s20, 256, %s469_s5, [#allocation3], %s375_s28, %s375_s28, %s376_s29  }
 0x1e9   :  { %370 = dma.done.wait [#allocation3], 256  }
 0x1ea   :  { %371 = vsyncadd [#allocation3], 4294967040 }
 0x1eb   :  { %257 = vsyncpa [#allocation3], 1 }

// kernel: egnn_layer_forward.2
= control target key start
LH: loop header
LB: loop body
LE: loop exit
PB: predicated region body
PF: predicated region fallthrough
CT: control target
= control target key end

     0   :  { %vm87_vm0 = vcmask 531456   ;;  %vm94_vm1 = vcmask 1040384   ;;  %v494_v6 = vmov 0   ;;  %v495_v49 = vmov 0.0   ;;  %s594_s2 = inlined_call_operand.vmem [shape: bf16[65,128], index: 2, kind: input, shape index: {}]   ;;  %s595_s0 = inlined_call_operand.vmem [shape: bf16[32,65], index: 0, kind: input, shape index: {}]   ;;  %s596_s4 = inlined_call_operand.vmem [shape: bf16[128,128], index: 4, kind: input, shape index: {}]   ;;  %s597_s3 = inlined_call_operand.vmem [shape: f32[1,128], index: 3, kind: input, shape index: {}]   ;;  %s598_s5 = inlined_call_operand.vmem [shape: f32[1,128], index: 5, kind: input, shape index: {}]   ;;  %s599_s1 = inlined_call_operand.vmem [shape: s32[1,32], index: 1, kind: input, shape index: {}]   ;;  %s600_s6 = inlined_call_operand.vmem [shape: f32[16,128], index: 6, kind: output, shape index: {}]  }
   0x1   :  { %v463_v0 = vld [vmem:[%s594_s2] sm:$0xff]   ;;  %v464_v1 = vld [vmem:[%s594_s2 + $0x8] sm:$0xff]   ;;  %v465_v2 = vld [vmem:[%s594_s2 + $0x10] sm:$0xff]   ;;  %v96_v7 = vsel %vm94_vm1, 65535, %v494_v6  ;;  %vm496_vm2 = vmmov 0   ;;  %v299_v50 = vlaneseq  ;;  %vm318_vm5 = vcmask 261120  }
   0x2   :  { %418 = vmatprep.subr.bf16.mxu0 %v463_v0  ;;  %v468_v3 = vld [vmem:[%s595_s0] sm:$0xff]   ;;  %v466_v4 = vld [vmem:[%s594_s2 + $0x18] sm:$0xff]   ;;  %v469_v9 = vld [vmem:[%s595_s0 + $0x8] sm:$0xff]  }
   0x3   :  { %419 = vmatpush3.bf16.msra.mxu0 %v463_v0  ;;  %428 = vmatprep.mubr.msk.bf16.mxu0 %vm87_vm0, %v468_v3  ;;  %v467_v5 = vld [vmem:[%s594_s2 + $0x20] ss:$0 sps:$4 sm:$0x11]   ;;  %v471_v11 = vld [vmem:[%s596_s4 + $0x8] sm:$0xff]   ;;  %v472_v12 = vld [vmem:[%s596_s4 + $0x10] sm:$0xff]   ;;  %v300_v51 = vshrl.u32 %v299_v50, 7 }
   0x4   :  { %420 = vmatprep.subr.bf16.mxu0 %v464_v1  ;;  %v98_v8 = vand.u32 %v467_v5, %v96_v7  ;;  %v470_v10 = vld [vmem:[%s596_s4] sm:$0xff]   ;;  %v473_v13 = vld [vmem:[%s596_s4 + $0x18] sm:$0xff]   ;;  %v475_v15 = vld [vmem:[%s596_s4 + $0x28] sm:$0xff]  }
   0x5   :  { %432 = vmatprep.subr.bf16.mxu1 %v470_v10  ;;  %v474_v14 = vld [vmem:[%s596_s4 + $0x20] sm:$0xff]   ;;  %v476_v16 = vld [vmem:[%s596_s4 + $0x30] sm:$0xff]   ;;  %v477_v17 = vld [vmem:[%s596_s4 + $0x38] sm:$0xff]   ;;  %v301_v55 = vadd.s32 8, %v300_v51 }
   0x6   :  { %433 = vmatpush3.bf16.msra.mxu1 %v470_v10  ;;  %v371_v18 = vld [vmem:[%s597_s3] ss:$0 sm:$0xff] }
   0x7   :  { %421 = vmatpush3.bf16.msra.mxu0 %v464_v1  ;;  %434 = vmatprep.subr.bf16.mxu1 %v471_v11  ;;  %v385_v53 = vld [vmem:[%s598_s5] ss:$0 sm:$0xff] }
   0x8   :  { %422 = vmatprep.subr.bf16.mxu0 %v465_v2  ;;  %v394_v57 = vld [vmem:[%s599_s1] ss:$0 sm:$0xff] }
   0x9   :  { %vm307_vm3 = vcmp.eq.s32.totalorder %v300_v51, %v394_v57  ;;  %vm308_vm4 = vcmp.eq.s32.totalorder %v301_v55, %v394_v57 }
   0xa   :  { %435 = vmatpush3.bf16.msra.mxu1 %v471_v11  ;;  %v395_v1 = vsel %vm307_vm3, 1.0, %v495_v49 }
   0xb   :  { %423 = vmatpush3.bf16.msra.mxu0 %v465_v2  ;;  %436 = vmatprep.subr.bf16.mxu1 %v472_v12  ;;  %v396_v2 = vsel %vm308_vm4, 1.0, %v495_v49 }
   0xc   :  { %424 = vmatprep.subr.bf16.mxu0 %v466_v4  ;;  %v313_v3 = vpack.c.bf16 %v396_v2, %v395_v1 }
   0xe   :  { %437 = vmatpush3.bf16.msra.mxu1 %v472_v12 }
   0xf   :  { %425 = vmatpush3.bf16.msra.mxu0 %v466_v4  ;;  %438 = vmatprep.subr.bf16.mxu1 %v473_v13 }
  0x10   :  { %426 = vmatprep.subr.bf16.mxu0 %v98_v8 }
  0x12   :  { %439 = vmatpush3.bf16.msra.mxu1 %v473_v13 }
  0x13   :  { %427 = vmatpush3.bf16.msra.mxu0 %v98_v8  ;;  %440 = vmatprep.subr.bf16.mxu1 %v474_v14 }
  0x14   :  { %452 = vmatprep.subr.bf16.mxu0 %v495_v49 }
  0x16   :  { %429 = vmatmul.mubr.msk.bf16.vlgmr.msra.gmra.mrb[0].mxu0 %vm87_vm0, %v469_v9  ;;  %441 = vmatpush3.bf16.msra.mxu1 %v474_v14 }
  0x17   :  { %442 = vmatprep.subr.bf16.mxu1 %v475_v15  ;;  %456 = vmatprep.mubr.msk.bf16.mxu0 %vm496_vm2, %v495_v49 }
  0x1a   :  { %443 = vmatpush3.bf16.msra.mxu1 %v475_v15 }
  0x1b   :  { %444 = vmatprep.subr.bf16.mxu1 %v476_v16 }
  0x1e   :  { %445 = vmatpush3.bf16.msra.mxu1 %v476_v16 }
  0x1f   :  { %446 = vmatprep.subr.bf16.mxu1 %v477_v17 }
  0x22   :  { %447 = vmatpush3.bf16.msra.mxu1 %v477_v17 }
  0xe9   :  { %v430_v19 = vpop.f32.mrb[0].mxu0 }
  0xea   :  { %v143_v20 = vadd.f32 %v430_v19, %v371_v18  ;;  %v134_v21 = vpop.f32.mrb[1].mxu0 }
  0xeb   :  { %v135_v22 = vadd.f32 %v371_v18, %v134_v21  ;;  %v431_v23 = vpop.f32.mrb[2].mxu0 }
  0xec   :  { %v383_v24 = vmul.f32 -1.442695, %v143_v20  ;;  %v146_v25 = vadd.f32 %v431_v23, %v371_v18  ;;  %v137_v26 = vpop.f32.mrb[3].mxu0 }
  0xed   :  { %v381_v27 = vmul.f32 -1.442695, %v135_v22  ;;  %v138_v28 = vadd.f32 %v371_v18, %v137_v26 }
  0xee   :  { %478 = vpow2.f32 %v383_v24  ;;  %v384_v29 = vmul.f32 -1.442695, %v146_v25 }
  0xef   :  { %480 = vpow2.f32 %v381_v27  ;;  %v382_v30 = vmul.f32 -1.442695, %v138_v28 }
  0xf0   :  { %482 = vpow2.f32 %v384_v29 }
  0xf1   :  { %484 = vpow2.f32 %v382_v30 }
  0xf8   :  { %v479_v31 = vpop.eup %478 }
  0xf9   :  { %v481_v32 = vpop.eup %480  ;;  %v163_v33 = vadd.f32 1.0, %v479_v31 }
  0xfa   :  { %v483_v34 = vpop.eup %482  ;;  %v161_v35 = vadd.f32 1.0, %v481_v32 }
  0xfb   :  { %v485_v36 = vpop.eup %484  ;;  %486 = vrcp.f32 %v163_v33  ;;  %v164_v37 = vadd.f32 1.0, %v483_v34 }
  0xfc   :  { %488 = vrcp.f32 %v161_v35  ;;  %v162_v38 = vadd.f32 1.0, %v485_v36 }
  0xfd   :  { %490 = vrcp.f32 %v164_v37 }
  0xfe   :  { %492 = vrcp.f32 %v162_v38 }
 0x105   :  { %v487_v39 = vpop.eup %486 }
 0x106   :  { %v489_v40 = vpop.eup %488  ;;  %v175_v43 = vmul.f32 %v487_v39, %v143_v20 }
 0x107   :  { %v491_v41 = vpop.eup %490  ;;  %v173_v45 = vmul.f32 %v489_v40, %v135_v22 }
 0x108   :  { %v493_v42 = vpop.eup %492  ;;  %v176_v44 = vmul.f32 %v491_v41, %v146_v25 }
 0x109   :  { %v174_v46 = vmul.f32 %v493_v42, %v138_v28 }
 0x10a   :  { %v178_v47 = vpack.c.bf16 %v176_v44, %v175_v43 }
 0x10b   :  { %v177_v48 = vpack.c.bf16 %v174_v46, %v173_v45 }
 0x10d   :  { %448 = vmatprep.mubr.bf16.mxu1 %v177_v48 }
 0x10e   :  { %449 = vmatmul.mubr.bf16.vlgmr.msra.gmra.mrb[0].mxu1 %v178_v47 }
 0x1e1   :  { %v450_v52 = vpop.f32.mrb[0].mxu1 }
 0x1e2   :  { %v284_v54 = vpop.f32.mrb[1].mxu1  ;;  %v293_v58 = vadd.f32 %v450_v52, %v385_v53 }
 0x1e3   :  { %v451_v56 = vpop.f32.mrb[2].mxu1  ;;  %v285_v61 = vadd.f32 %v385_v53, %v284_v54 }
 0x1e4   :  { %v296_v59 = vadd.f32 %v451_v56, %v385_v53  ;;  %v287_v60 = vpop.f32.mrb[3].mxu1 }
 0x1e5   :  { %v288_v62 = vadd.f32 %v385_v53, %v287_v60 }
 0x1e6   :  { %v317_v63 = vpack.c.bf16 %v296_v59, %v293_v58 }
 0x1e7   :  { %v316_v0 = vpack.c.bf16 %v288_v62, %v285_v61 }
 0x1e9   :  { %453 = vmatpush3.bf16.msra.mxu0 %v316_v0 }
 0x1ea   :  { %454 = vmatprep.subr.bf16.mxu0 %v495_v49 }
 0x1ed   :  { %455 = vmatpush3.bf16.msra.mxu0 %v317_v63 }
 0x1f0   :  { %457 = vmatmul.mubr.msk.bf16.vlgmr.msra.gmra.mrb[4].mxu0 %vm318_vm5, %v313_v3 }
 0x2c3   :  { %v356_v4 = vpop.f32.mrb[4].mxu0 }
 0x2c4   :  { %v458_v5 = vpop.f32.mrb[5].mxu0  ;;  %365 = vst [vmem:[%s600_s6] sm:$0xff] %v356_v4 }
 0x2c5   :  { %v359_v6 = vpop.f32.mrb[6].mxu0 }
 0x2c6   :  { %v459_v7 = vpop.f32.mrb[7].mxu0  ;;  %366 = vst [vmem:[%s600_s6 + $0x8] sm:$0xff] %v359_v6 }

</bundles_post_ra>
